<compile_context>
chip_gen: v6e
topology: v6e:2x2x1
jax: 0.10.0
libtpu: 0.0.40
codegen_flags: <defaults>
</compile_context>

<pallas_src>
import jax
import jax.numpy as jnp
import numpy as np
from jax.experimental import pallas as pl
from jax.experimental.pallas import tpu as pltpu

# Raise the scoped-VMEM limit (defaults: ~16 MiB v5e / 32 MiB v6e & v7x) while
# staying safely under the smallest physical VMEM (64 MiB per TensorCore, v7x).
_VMEM_LIMIT_BYTES = 48 * 1024 * 1024
# Target resident bytes per grid step (double-buffered in/out blocks + temps),
# kept well under the limit so Mosaic has headroom for its own scratch.
_VMEM_BUDGET_BYTES = 20 * 1024 * 1024


def _round_up(n: int, m: int) -> int:
    return ((n + m - 1) // m) * m


def _lane_bytes(width: int) -> int:
    """Bytes one f32 row of `width` occupies in VMEM (lane-padded to 128)."""
    return _round_up(max(int(width), 1), 128) * 4


def _pick_tile(n_rows: int, max_tile: int, min_tile: int = 512) -> int:
    """Rows per grid step: as large as the VMEM budget allows, but keep >= 2
    grid steps for large inputs so the 'parallel' batch axis can shard across
    TensorCores (v7x megacore).  Tiles are sublane-aligned (multiple of 8) or
    equal to the full extent — both legal block shapes."""
    max_tile = max(8, (max_tile // 8) * 8)
    if n_rows > max_tile:
        return max_tile
    if n_rows >= 2 * min_tile:
        return max(min_tile, _round_up((n_rows + 1) // 2, 8))
    return n_rows


def _ann_packed_kernel(x_ref, w1_ref, b1_ref, w2_ref, b2_ref, out_ref):
    """Lane-dense fast path.  x_ref holds P original rows per packed row:
         x_ref : (T, P*D)      w1_ref : (P*D, P*H) = kron(I_P, W1)
         out   : (T, P*C)      w2_ref : (P*H, P*C) = kron(I_P, W2 @ Dm)
    The 2-class softmax is folded into W2 via the difference matrix Dm, i.e.
    prob_j = sigmoid(logit_j - logit_other), so the epilogue is elementwise."""
    xp = x_ref[...]                                                     # (T, P*D)
    h = jnp.dot(xp, w1_ref[...], preferred_element_type=jnp.float32) + b1_ref[...]
    h = jnp.maximum(h, 0.0)                                             # (T, P*H)
    d = jnp.dot(h, w2_ref[...], preferred_element_type=jnp.float32) + b2_ref[...]
    # sigmoid via exp (EUP) + exact reciprocal; stays elementwise / lane-dense.
    out_ref[...] = pl.reciprocal(1.0 + jnp.exp(-d), approx=False)       # (T, P*C)


def _ann_direct_kernel(x_ref, w1_ref, b1_ref, w2_ref, b2_ref, out_ref):
    """General path: one (T, D) batch tile -> (T, C) probabilities."""
    x = x_ref[...]                                                      # (T, D)
    h = jnp.dot(x, w1_ref[...], preferred_element_type=jnp.float32) + b1_ref[...]
    h = jnp.maximum(h, 0.0)                                             # (T, H)
    logits = jnp.dot(h, w2_ref[...], preferred_element_type=jnp.float32) + b2_ref[...]
    m = jnp.max(logits, axis=1, keepdims=True)                          # stable softmax
    e = jnp.exp(logits - m)
    out_ref[...] = e * pl.reciprocal(jnp.sum(e, axis=1, keepdims=True), approx=False)


def _cost(B, D, H, C):
    return pl.CostEstimate(
        flops=2 * B * (D * H + H * C),
        transcendentals=B * C,
        bytes_accessed=4 * (B * D + B * C + D * H + H + H * C + C))


def _compiler_params():
    return pltpu.CompilerParams(
        dimension_semantics=("parallel",),
        vmem_limit_bytes=_VMEM_LIMIT_BYTES)


def _ann_forward_packed(x, w1_t, b1, w2_t, b2, block_rows):
    B, D = x.shape
    H = w1_t.shape[1]
    C = w2_t.shape[1]            # == 2 on this path
    P = 128 // D
    n_pack = B // P
    xp = x.reshape(n_pack, P * D)        # free row-major view; 128-lane-dense rows

    # Block-diagonal weights keep the packed matmuls lane-dense.  (Tiny arrays;
    # in a real deployment these would be precomputed once per model.)
    eye_p = jnp.eye(P, dtype=jnp.float32)
    w1_bd = jnp.kron(eye_p, w1_t.astype(jnp.float32))                     # (P*D, P*H)
    b1_bd = jnp.tile(b1.astype(jnp.float32).reshape(1, H), (1, P))        # (1, P*H)
    # Fold the 2-class softmax into W2:  softmax([l0,l1]) == sigmoid([l0-l1, l1-l0]).
    dm = jnp.array([[1.0, -1.0], [-1.0, 1.0]], jnp.float32)
    w2_bd = jnp.kron(eye_p, w2_t.astype(jnp.float32) @ dm)                # (P*H, P*C)
    b2_bd = jnp.tile(b2.astype(jnp.float32).reshape(1, C) @ dm, (1, P))   # (1, P*C)

    per_row = (2 * _lane_bytes(P * D)       # x block, double-buffered
               + 2 * _lane_bytes(P * C)     # out block, double-buffered
               + _lane_bytes(P * H)         # relu activation temporary
               + 512)                       # misc temporaries
    max_tile = min(4096, _VMEM_BUDGET_BYTES // per_row)
    if block_rows is not None:
        max_tile = max(1, block_rows // P)
    tile = _pick_tile(n_pack, max_tile)
    grid = (pl.cdiv(n_pack, tile),)

    out = pl.pallas_call(
        _ann_packed_kernel,
        out_shape=jax.ShapeDtypeStruct((n_pack, P * C), jnp.float32),
        grid=grid,
        in_specs=[
            pl.BlockSpec((tile, P * D), lambda i: (i, 0)),    # stream packed x tiles
            pl.BlockSpec((P * D, P * H), lambda i: (0, 0)),   # weights VMEM-resident
            pl.BlockSpec((1, P * H), lambda i: (0, 0)),
            pl.BlockSpec((P * H, P * C), lambda i: (0, 0)),
            pl.BlockSpec((1, P * C), lambda i: (0, 0)),
        ],
        out_specs=pl.BlockSpec((tile, P * C), lambda i: (i, 0)),
        compiler_params=_compiler_params(),
        cost_estimate=_cost(B, D, H, C),
    )(xp, w1_bd, b1_bd, w2_bd, b2_bd)
    return out.reshape(B, C)                 # free row-major view back to (B, C)


def _ann_forward_direct(x, w1_t, b1, w2_t, b2, block_rows):
    B, D = x.shape
    H = w1_t.shape[1]
    C = w2_t.shape[1]
    per_row = (2 * _lane_bytes(D) + 2 * _lane_bytes(C) + _lane_bytes(H) + 512)
    max_tile = min(8192, _VMEM_BUDGET_BYTES // per_row)
    if block_rows is not None:
        max_tile = max(1, block_rows)
    tile = _pick_tile(B, max_tile)
    grid = (pl.cdiv(B, tile),)

    out = pl.pallas_call(
        _ann_direct_kernel,
        out_shape=jax.ShapeDtypeStruct((B, C), jnp.float32),
        grid=grid,
        in_specs=[
            pl.BlockSpec((tile, D), lambda i: (i, 0)),        # stream x tiles
            pl.BlockSpec((D, H), lambda i: (0, 0)),           # weights VMEM-resident
            pl.BlockSpec((1, H), lambda i: (0, 0)),
            pl.BlockSpec((H, C), lambda i: (0, 0)),
            pl.BlockSpec((1, C), lambda i: (0, 0)),
        ],
        out_specs=pl.BlockSpec((tile, C), lambda i: (i, 0)),
        compiler_params=_compiler_params(),
        cost_estimate=_cost(B, D, H, C),
    )(x, w1_t.astype(jnp.float32), b1.astype(jnp.float32).reshape(1, H),
      w2_t.astype(jnp.float32), b2.astype(jnp.float32).reshape(1, C))
    return out


def ann_forward(x, w1_t, b1, w2_t, b2, *, block_rows=None):
    """Forward pass of the ANN module (class probabilities, softmax over dim=1).

    x:    [B, D] float32 tabular input
    w1_t: [D, H] (PyTorch weight transposed), b1: [1, H]
    w2_t: [H, C],                              b2: [1, C]
    block_rows: optional override of batch rows per grid step.
    """
    x = jnp.asarray(x, jnp.float32)
    B, D = x.shape
    C = w2_t.shape[1]
    pack = 128 // D if (0 < D <= 128 and 128 % D == 0) else 0
    if pack and (B % pack == 0) and C == 2:
        return _ann_forward_packed(x, w1_t, b1, w2_t, b2, block_rows)
    return _ann_forward_direct(x, w1_t, b1, w2_t, b2, block_rows)


def init_ann_params(key, input_layer, hidden_layer_1, num_of_classes):
    """Deterministic init mimicking nn.Linear's U(-1/sqrt(fan_in), 1/sqrt(fan_in)).
    PyTorch stores weight as [out, in]; we keep the transposed [in, out] layout."""
    k1, k2, k3, k4 = jax.random.split(key, 4)
    bound1 = 1.0 / np.sqrt(input_layer)
    bound2 = 1.0 / np.sqrt(hidden_layer_1)
    w1_t = jax.random.uniform(k1, (input_layer, hidden_layer_1),
                              minval=-bound1, maxval=bound1, dtype=jnp.float32)
    b1 = jax.random.uniform(k2, (1, hidden_layer_1),
                            minval=-bound1, maxval=bound1, dtype=jnp.float32)
    w2_t = jax.random.uniform(k3, (hidden_layer_1, num_of_classes),
                              minval=-bound2, maxval=bound2, dtype=jnp.float32)
    b2 = jax.random.uniform(k4, (1, num_of_classes),
                            minval=-bound2, maxval=bound2, dtype=jnp.float32)
    return w1_t, b1, w2_t, b2


def _reference(x, w1_t, b1, w2_t, b2):
    h = jnp.maximum(x @ w1_t + b1, 0.0)
    return jax.nn.softmax(h @ w2_t + b2, axis=1)


if __name__ == "__main__":
    D, H, C = 16, 32, 2
    key = jax.random.PRNGKey(0)
    kp, k1, k2, k3, kp2, k4 = jax.random.split(key, 6)
    params = init_ann_params(kp, D, H, C)

    def check(x, prm, **kw):
        probs = jax.block_until_ready(ann_forward(x, *prm, **kw))
        ref = _reference(x, *prm)
        np.testing.assert_allclose(np.asarray(probs), np.asarray(ref), rtol=1e-5, atol=1e-5)
        np.testing.assert_allclose(np.asarray(probs).sum(axis=1),
                                   np.ones(x.shape[0]), rtol=1e-5, atol=1e-5)
        return probs

    # 1) Packed lane-dense fast path, single tile (B % (128 // D) == 0).
    x1 = jax.random.normal(k1, (64, D), dtype=jnp.float32)
    p1 = check(x1, params)
    assert p1.shape == (64, C)

    # 2) Packed path, multi-step grid with a ragged (masked) last tile:
    #    B=2000 -> 250 packed rows; block_rows=800 -> 96-row packed tiles -> 3 steps.
    x2 = jax.random.normal(k2, (2000, D), dtype=jnp.float32)
    p2 = check(x2, params, block_rows=800)
    assert p2.shape == (2000, C)

    # 3) Direct fallback path (B not a multiple of 8 -> no repack); cdiv grid,
    #    multiple steps, ragged masked last tile — no jnp.pad anywhere.
    x3 = jax.random.normal(k3, (301, D), dtype=jnp.float32)
    p3 = check(x3, params, block_rows=128)
    assert p3.shape == (301, C)

    # 4) Direct fallback: D that doesn't divide 128 and C=3 (generic stable softmax).
    D4, H4, C4 = 20, 32, 3
    params4 = init_ann_params(kp2, D4, H4, C4)
    x4 = jax.random.normal(k4, (40, D4), dtype=jnp.float32)
    p4 = check(x4, params4)
    assert p4.shape == (40, C4)

    print("KERNEL_OK")
</pallas_src>

<mosaic_0001>
module attributes {stable_mosaic.version = 11 : i64} {
  func.func @_ann_packed_kernel(%arg0: i32, %arg1: memref<8x128xf32, #tpu.memory_space<vmem>>, %arg2: memref<128x256xf32, #tpu.memory_space<vmem>>, %arg3: memref<1x256xf32, #tpu.memory_space<vmem>>, %arg4: memref<256x16xf32, #tpu.memory_space<vmem>>, %arg5: memref<1x16xf32, #tpu.memory_space<vmem>>, %arg6: memref<8x16xf32, #tpu.memory_space<vmem>>) attributes {dimension_semantics = [#tpu.dimension_semantics<parallel>], iteration_bounds = array<i64: 1>, scalar_prefetch = 0 : i64, scratch_operands = 0 : i64, tpu.core_type = #tpu.core_type<tc>, window_params = [{transform_indices = @transform_0, window_bounds = array<i64: 8, 128>}, {pipeline_mode = #tpu.pipeline_mode<synchronous>, transform_indices = @transform_1, window_bounds = array<i64: 128, 256>}, {pipeline_mode = #tpu.pipeline_mode<synchronous>, transform_indices = @transform_2, window_bounds = array<i64: 1, 256>}, {pipeline_mode = #tpu.pipeline_mode<synchronous>, transform_indices = @transform_3, window_bounds = array<i64: 256, 16>}, {pipeline_mode = #tpu.pipeline_mode<synchronous>, transform_indices = @transform_4, window_bounds = array<i64: 1, 16>}, {transform_indices = @transform_5, window_bounds = array<i64: 8, 16>}]} {
    %c0 = arith.constant 0 : index
    %c0_0 = arith.constant 0 : index
    %0 = vector.load %arg1[%c0, %c0_0] : memref<8x128xf32, #tpu.memory_space<vmem>>, vector<8x128xf32>
    %c0_1 = arith.constant 0 : index
    %c0_2 = arith.constant 0 : index
    %1 = vector.load %arg2[%c0_1, %c0_2] : memref<128x256xf32, #tpu.memory_space<vmem>>, vector<128x256xf32>
    %cst = arith.constant dense<0.000000e+00> : vector<8x256xf32>
    %2 = tpu.matmul %0, %1, %cst {dimension_numbers = #tpu.dot_dimension_numbers<[1], [0], [0], [1], [0, 0, 1, 1], [], []>} : vector<8x128xf32>, vector<128x256xf32>, vector<8x256xf32> -> vector<8x256xf32>
    %c0_3 = arith.constant 0 : index
    %c0_4 = arith.constant 0 : index
    %3 = vector.load %arg3[%c0_3, %c0_4] : memref<1x256xf32, #tpu.memory_space<vmem>>, vector<1x256xf32>
    %4 = vector.broadcast %3 : vector<1x256xf32> to vector<8x256xf32>
    %5 = arith.addf %2, %4 : vector<8x256xf32>
    %cst_5 = arith.constant 0.000000e+00 : f32
    %6 = vector.broadcast %cst_5 : f32 to vector<8x256xf32>
    %7 = arith.maximumf %5, %6 : vector<8x256xf32>
    %c0_6 = arith.constant 0 : index
    %c0_7 = arith.constant 0 : index
    %8 = vector.load %arg4[%c0_6, %c0_7] : memref<256x16xf32, #tpu.memory_space<vmem>>, vector<256x16xf32>
    %cst_8 = arith.constant dense<0.000000e+00> : vector<8x16xf32>
    %9 = tpu.matmul %7, %8, %cst_8 {dimension_numbers = #tpu.dot_dimension_numbers<[1], [0], [0], [1], [0, 0, 1, 1], [], []>} : vector<8x256xf32>, vector<256x16xf32>, vector<8x16xf32> -> vector<8x16xf32>
    %c0_9 = arith.constant 0 : index
    %c0_10 = arith.constant 0 : index
    %10 = vector.load %arg5[%c0_9, %c0_10] : memref<1x16xf32, #tpu.memory_space<vmem>>, vector<1x16xf32>
    %11 = vector.broadcast %10 : vector<1x16xf32> to vector<8x16xf32>
    %12 = arith.addf %9, %11 : vector<8x16xf32>
    %cst_11 = arith.constant 0.000000e+00 : f32
    %13 = vector.broadcast %cst_11 : f32 to vector<8x16xf32>
    %14 = arith.subf %13, %12 : vector<8x16xf32>
    %15 = math.exp %14 : vector<8x16xf32>
    %cst_12 = arith.constant 1.000000e+00 : f32
    %16 = vector.broadcast %cst_12 : f32 to vector<8x16xf32>
    %17 = arith.addf %16, %15 : vector<8x16xf32>
    %18 = tpu.reciprocal %17 : vector<8x16xf32> -> vector<8x16xf32>
    %c0_13 = arith.constant 0 : index
    %c0_14 = arith.constant 0 : index
    %19 = vector.load %arg6[%c0_13, %c0_14] : memref<8x16xf32, #tpu.memory_space<vmem>>, vector<8x16xf32>
    tpu.vector_store %arg6[%c0_13, %c0_14], %18 {strides = array<i32>} : memref<8x16xf32, #tpu.memory_space<vmem>>, vector<8x16xf32>,
    return
  }
  func.func @transform_0(%arg0: i32) -> (i32, i32) {
    %c0_i32 = arith.constant 0 : i32
    %c0_i32_0 = arith.constant 0 : i32
    return %arg0, %c0_i32 : i32, i32
  }
  func.func @transform_1(%arg0: i32) -> (i32, i32) {
    %c0_i32 = arith.constant 0 : i32
    %c0_i32_0 = arith.constant 0 : i32
    %c0_i32_1 = arith.constant 0 : i32
    return %c0_i32, %c0_i32_0 : i32, i32
  }
  func.func @transform_2(%arg0: i32) -> (i32, i32) {
    %c0_i32 = arith.constant 0 : i32
    %c0_i32_0 = arith.constant 0 : i32
    %c0_i32_1 = arith.constant 0 : i32
    return %c0_i32, %c0_i32_0 : i32, i32
  }
  func.func @transform_3(%arg0: i32) -> (i32, i32) {
    %c0_i32 = arith.constant 0 : i32
    %c0_i32_0 = arith.constant 0 : i32
    %c0_i32_1 = arith.constant 0 : i32
    return %c0_i32, %c0_i32_0 : i32, i32
  }
  func.func @transform_4(%arg0: i32) -> (i32, i32) {
    %c0_i32 = arith.constant 0 : i32
    %c0_i32_0 = arith.constant 0 : i32
    %c0_i32_1 = arith.constant 0 : i32
    return %c0_i32, %c0_i32_0 : i32, i32
  }
  func.func @transform_5(%arg0: i32) -> (i32, i32) {
    %c0_i32 = arith.constant 0 : i32
    %c0_i32_0 = arith.constant 0 : i32
    return %arg0, %c0_i32 : i32, i32
  }
}

</mosaic_0001>

<bundles_post_ra>
// kernel: tpu_custom_call.1
= control target key start
LH: loop header
LB: loop body
LE: loop exit
PB: predicated region body
PF: predicated region fallthrough
CT: control target
= control target key end

     0   :  { %v333_v4 = vmov 0.0   ;;  %s569_s0 = inlined_call_operand.vmem [shape: f32[8,128], index: 0, kind: input, shape index: {}]   ;;  %s570_s1 = inlined_call_operand.vmem [shape: f32[128,256], index: 1, kind: input, shape index: {}]   ;;  %s571_s2 = inlined_call_operand.vmem [shape: f32[1,256], index: 2, kind: input, shape index: {}]   ;;  %s572_s3 = inlined_call_operand.vmem [shape: f32[256,16], index: 3, kind: input, shape index: {}]   ;;  %s573_s4 = inlined_call_operand.vmem [shape: f32[1,16], index: 4, kind: input, shape index: {}]   ;;  %s574_s5 = inlined_call_operand.hbm [shape: f32[8,16], index: 5, kind: output, shape index: {}]  }
   0x1   :  { %v53_v0 = vld [vmem:[%s570_s1 + $0xf8] sm:$0xff]  ;;  %v52_v1 = vld [vmem:[%s570_s1 + $0xf0] sm:$0xff]  ;;  %v51_v2 = vld [vmem:[%s570_s1 + $0xe8] sm:$0xff]  ;;  %130 = vmatprep.mubr.f32.mxu0 %v333_v4 }
   0x2   :  { %66 = vmatprep.subr.mxu0 %v53_v0  ;;  %v50_v3 = vld [vmem:[%s570_s1 + $0xe0] sm:$0xff]  ;;  %v49_v5 = vld [vmem:[%s570_s1 + $0xd8] sm:$0xff]  ;;  %v48_v6 = vld [vmem:[%s570_s1 + $0xd0] sm:$0xff] }
   0x3   :  { %67 = vmatpush1.msra.mxu0 %v52_v1  ;;  %v47_v7 = vld [vmem:[%s570_s1 + $0xc8] sm:$0xff]  ;;  %v46_v8 = vld [vmem:[%s570_s1 + $0xc0] sm:$0xff]  ;;  %v45_v9 = vld [vmem:[%s570_s1 + $0xb8] sm:$0xff] }
   0x4   :  { %68 = vmatprep.subr.mxu0 %v51_v2  ;;  %v44_v10 = vld [vmem:[%s570_s1 + $0xb0] sm:$0xff]  ;;  %v43_v11 = vld [vmem:[%s570_s1 + $0xa8] sm:$0xff]  ;;  %v42_v12 = vld [vmem:[%s570_s1 + $0xa0] sm:$0xff] }
   0x5   :  { %69 = vmatpush1.msra.mxu0 %v50_v3  ;;  %v41_v13 = vld [vmem:[%s570_s1 + $0x98] sm:$0xff]  ;;  %v40_v14 = vld [vmem:[%s570_s1 + $0x90] sm:$0xff]  ;;  %v39_v18 = vld [vmem:[%s570_s1 + $0x88] sm:$0xff] }
   0x6   :  { %70 = vmatprep.subr.mxu0 %v49_v5  ;;  %v170_v15 = vld [vmem:[%s572_s3 + $0xf8] sm:$0xff]  ;;  %v169_v17 = vld [vmem:[%s572_s3 + $0xf0] sm:$0xff]  ;;  %v38_v20 = vld [vmem:[%s570_s1 + $0x80] sm:$0xff] }
   0x7   :  { %71 = vmatpush1.msra.mxu0 %v48_v6  ;;  %v154_v16 = vld [vmem:[%s572_s3 + $0x78] sm:$0xff]  ;;  %270 = vmatprep.subr.mxu1 %v170_v15  ;;  %v153_v19 = vld [vmem:[%s572_s3 + $0x70] sm:$0xff]  ;;  %v168_v21 = vld [vmem:[%s572_s3 + $0xe8] sm:$0xff] }
   0x8   :  { %72 = vmatprep.subr.mxu0 %v47_v7  ;;  %271 = vmatpush3.msra.mxu1 %v154_v16  ;;  %v37_v22 = vld [vmem:[%s570_s1 + $0x78] sm:$0xff]  ;;  %v152_v23 = vld [vmem:[%s572_s3 + $0x68] sm:$0xff]  ;;  %v36_v24 = vld [vmem:[%s570_s1 + $0x70] sm:$0xff] }
   0x9   :  { %73 = vmatpush1.msra.mxu0 %v46_v8  ;;  %272 = vmatprep.subr.mxu1 %v169_v17  ;;  %v167_v25 = vld [vmem:[%s572_s3 + $0xe0] sm:$0xff]  ;;  %v35_v26 = vld [vmem:[%s570_s1 + $0x68] sm:$0xff]  ;;  %v166_v29 = vld [vmem:[%s572_s3 + $0xd8] sm:$0xff] }
   0xa   :  { %74 = vmatprep.subr.mxu0 %v45_v9  ;;  %273 = vmatpush3.msra.mxu1 %v153_v19  ;;  %v151_v27 = vld [vmem:[%s572_s3 + $0x60] sm:$0xff]  ;;  %v33_v30 = vld [vmem:[%s570_s1 + $0x58] sm:$0xff]  ;;  %v32_v32 = vld [vmem:[%s570_s1 + $0x50] sm:$0xff] }
   0xb   :  { %75 = vmatpush1.msra.mxu0 %v44_v10  ;;  %274 = vmatprep.subr.mxu1 %v168_v21  ;;  %v34_v28 = vld [vmem:[%s570_s1 + $0x60] sm:$0xff]  ;;  %v150_v31 = vld [vmem:[%s572_s3 + $0x58] sm:$0xff]  ;;  %v165_v33 = vld [vmem:[%s572_s3 + $0xd0] sm:$0xff] }
   0xc   :  { %76 = vmatprep.subr.mxu0 %v43_v11  ;;  %275 = vmatpush3.msra.mxu1 %v152_v23 }
   0xd   :  { %77 = vmatpush1.msra.mxu0 %v42_v12  ;;  %276 = vmatprep.subr.mxu1 %v167_v25 }
   0xe   :  { %78 = vmatprep.subr.mxu0 %v41_v13  ;;  %277 = vmatpush3.msra.mxu1 %v151_v27 }
   0xf   :  { %79 = vmatpush1.msra.mxu0 %v40_v14 }
  0x10   :  { %80 = vmatprep.subr.mxu0 %v39_v18 }
  0x11   :  { %81 = vmatpush1.msra.mxu0 %v38_v20 }
  0x12   :  { %82 = vmatprep.subr.mxu0 %v37_v22 }
  0x13   :  { %83 = vmatpush1.msra.mxu0 %v36_v24 }
  0x14   :  { %84 = vmatprep.subr.mxu0 %v35_v26 }
  0x15   :  { %10 = vsyncpa [#allocation3], 0  ;;  %85 = vmatpush1.msra.mxu0 %v34_v28  ;;  %v31_v34 = vld [vmem:[%s570_s1 + $0x48] sm:$0xff]  ;;  %278 = vmatprep.subr.mxu1 %v166_v29  ;;  %v149_v35 = vld [vmem:[%s572_s3 + $0x50] sm:$0xff]  ;;  %v56_v2 = vlaneseq  ;;  %vm253_vm0 = vcmask 130048  }
  0x16   :  { %86 = vmatprep.subr.mxu0 %v33_v30  ;;  %v30_v36 = vld [vmem:[%s570_s1 + $0x40] sm:$0xff]  ;;  %279 = vmatpush3.msra.mxu1 %v150_v31  ;;  %v164_v37 = vld [vmem:[%s572_s3 + $0xc8] sm:$0xff]  ;;  %v29_v38 = vld [vmem:[%s570_s1 + $0x38] sm:$0xff] }
  0x17   :  { %87 = vmatpush1.msra.mxu0 %v32_v32  ;;  %280 = vmatprep.subr.mxu1 %v165_v33  ;;  %v148_v39 = vld [vmem:[%s572_s3 + $0x48] sm:$0xff]  ;;  %v28_v40 = vld [vmem:[%s570_s1 + $0x30] sm:$0xff]  ;;  %v163_v41 = vld [vmem:[%s572_s3 + $0xc0] sm:$0xff]  ;;  %v57_v3 = vshrl.u32 %v56_v2, 7 }
  0x18   :  { %88 = vmatprep.subr.mxu0 %v31_v34  ;;  %281 = vmatpush3.msra.mxu1 %v149_v35  ;;  %v27_v42 = vld [vmem:[%s570_s1 + $0x28] sm:$0xff]  ;;  %v147_v43 = vld [vmem:[%s572_s3 + $0x40] sm:$0xff]  ;;  %v162_v45 = vld [vmem:[%s572_s3 + $0xb8] sm:$0xff] }
  0x19   :  { %89 = vmatpush1.msra.mxu0 %v30_v36  ;;  %282 = vmatprep.subr.mxu1 %v164_v37  ;;  %v26_v44 = vld [vmem:[%s570_s1 + $0x20] sm:$0xff]  ;;  %v25_v46 = vld [vmem:[%s570_s1 + $0x18] sm:$0xff]  ;;  %v24_v48 = vld [vmem:[%s570_s1 + $0x10] sm:$0xff]  ;;  %v58_v4 = vsub.s32 0, %v57_v3  ;;  %v62_v6 = vsub.s32 1, %v57_v3 }
  0x1a   :  { %90 = vmatprep.subr.mxu0 %v29_v38  ;;  %283 = vmatpush3.msra.mxu1 %v148_v39  ;;  %v146_v47 = vld [vmem:[%s572_s3 + $0x38] sm:$0xff]  ;;  %v161_v49 = vld [vmem:[%s572_s3 + $0xb0] sm:$0xff]  ;;  %v23_v50 = vld [vmem:[%s570_s1 + $0x8] sm:$0xff] }
  0x1b   :  { %91 = vmatpush1.msra.mxu0 %v28_v40  ;;  %284 = vmatprep.subr.mxu1 %v163_v41  ;;  %v145_v51 = vld [vmem:[%s572_s3 + $0x30] sm:$0xff]  ;;  %v22_v52 = vld [vmem:[%s570_s1] sm:$0xff]  ;;  %v160_v53 = vld [vmem:[%s572_s3 + $0xa8] sm:$0xff] }
  0x1c   :  { %92 = vmatprep.subr.mxu0 %v27_v42  ;;  %285 = vmatpush3.msra.mxu1 %v147_v43  ;;  %v21_v54 = vld [vmem:[%s569_s0] sm:$0xff]  ;;  %v144_v55 = vld [vmem:[%s572_s3 + $0x28] sm:$0xff]  ;;  %v158_v58 = vld [vmem:[%s572_s3 + $0x98] sm:$0xff] }
  0x1d   :  { %93 = vmatpush1.msra.mxu0 %v26_v44  ;;  %286 = vmatprep.subr.mxu1 %v162_v45  ;;  %v159_v56 = vld [vmem:[%s572_s3 + $0xa0] sm:$0xff]  ;;  %v142_v59 = vld [vmem:[%s572_s3 + $0x18] sm:$0xff]  ;;  %v157_v60 = vld [vmem:[%s572_s3 + $0x90] sm:$0xff] }
  0x1e   :  { %94 = vmatprep.subr.mxu0 %v25_v46  ;;  %287 = vmatpush3.msra.mxu1 %v146_v47  ;;  %v143_v57 = vld [vmem:[%s572_s3 + $0x20] sm:$0xff]  ;;  %v141_v61 = vld [vmem:[%s572_s3 + $0x10] sm:$0xff]  ;;  %v156_v62 = vld [vmem:[%s572_s3 + $0x88] sm:$0xff] }
  0x1f   :  { %95 = vmatpush1.msra.mxu0 %v24_v48  ;;  %288 = vmatprep.subr.mxu1 %v161_v49  ;;  %v140_v63 = vld [vmem:[%s572_s3 + $0x8] sm:$0xff]  ;;  %v155_v0 = vld [vmem:[%s572_s3 + $0x80] sm:$0xff] }
  0x20   :  { %96 = vmatprep.subr.mxu0 %v23_v50  ;;  %289 = vmatpush3.msra.mxu1 %v145_v51  ;;  %v139_v1 = vld [vmem:[%s572_s3] sm:$0xff] }
  0x21   :  { %97 = vmatpush1.msra.mxu0 %v22_v52  ;;  %290 = vmatprep.subr.mxu1 %v160_v53  ;;  %v54_v5 = vld [vmem:[%s571_s2] sm:$0x3]  ;;  %s334_s2 = smov [#allocation2]  }
  0x22   :  { %131 = vmatmul.mubr.f32.vlgmr.msra.gmra.mxu0 %v21_v54  ;;  %291 = vmatpush3.msra.mxu1 %v144_v55  ;;  %v59_v7 = vrot.slane %v54_v5, %v58_v4  ;;  %v63_v8 = vrot.slane %v54_v5, %v62_v6  ;;  %v269_v16 = vld [vmem:[%s573_s4] ss:$0 sm:$0xff]  ;;  %s261_s24 = sshll.u32 %s334_s2, 4  ;;  %s262_s24 = int_to_ptr.vmem [resolvable:$true] %s261_s24 }
  0x23   :  { %292 = vmatprep.subr.mxu1 %v159_v56  ;;  %s311_s25 = scalar_lea.vmem %s262_s24, 128  ;;  %p316_p1 = scmp.lt.s32.totalorder %s262_s24, %s262_s24 }
  0x24   :  { %293 = vmatpush3.msra.mxu1 %v143_v57  ;;  %p312_p0 = scmp.ne.s32.totalorder %s262_s24, %s311_s25  ;;  %p317_p2 = scmp.lt.s32.totalorder %s311_s25, %s311_s25 }
  0x25   :  { %294 = vmatprep.subr.mxu1 %v158_v58 }
  0x26   :  { %295 = vmatpush3.msra.mxu1 %v142_v59  ;;  %p318_p3 = por %p317_p2, %p316_p1 }
  0x27   :  { %296 = vmatprep.subr.mxu1 %v157_v60 }
  0x28   :  { %297 = vmatpush3.msra.mxu1 %v141_v61  ;;  %p319_p4 = pnand %p318_p3, %p312_p0 }
  0x29   :  { %298 = vmatprep.subr.mxu1 %v156_v62 }
  0x2a   :  { %299 = vmatpush3.msra.mxu1 %v140_v63 }
  0x2b   :  { %300 = vmatprep.subr.mxu1 %v155_v0 }
  0x2c   :  { %301 = vmatpush3.msra.mxu1 %v139_v1 }
  0xe2   :  { %v132_v9 = vpop.f32.mrf.mxu0 }
  0xe3   :  { %v133_v10 = vadd.f32 %v132_v9, %v59_v7 }
  0xe4   :  { %v134_v11 = vpop.f32.mrf.mxu0 }
  0xe5   :  { %v135_v12 = vadd.f32 %v134_v11, %v63_v8  ;;  %v137_v14 = vmax.f32 %v133_v10, 0.0 }
  0xe7   :  { %v138_v13 = vmax.f32 %v135_v12, 0.0 }
  0xe9   :  { %242 = vmatprep.mubr.f32.mxu1 %v138_v13 }
  0xea   :  { %243 = vmatmul.mubr.f32.vlgmr.msra.gmra.mxu1 %v137_v14 }
 0x1aa   :  { %v302_v15 = vpop.f32.mrf.mxu1 }
 0x1ac   :  { %v303_v17 = vpop.f32.mrf.mxu1 }
 0x1ad   :  { %v304_v18 = vadd.f32 %v303_v17, %v302_v15 }
 0x1af   :  { %v245_v19 = vadd.f32 %v304_v18, %v269_v16 }
 0x1b1   :  { %v248_v20 = vsub.f32 0.0, %v245_v19 }
 0x1b3   :  { %v249_v21 = vmul.f32 1.442695, %v248_v20 }
 0x1b5   :  { %307 = vpow2.f32 %v249_v21 }
 0x1c2   :  { %v308_v22 = vpop.eup %307 }
 0x1c3   :  { %v251_v23 = vadd.f32 1.0, %v308_v22 }
 0x1c5   :  { %309 = vrcp.f32 %v251_v23 }
 0x1d2   :  { %v310_v24 = vpop.eup %309 }
 0x1d3   :  { %254 = vst.msk [vmem:[#allocation2] sm:$0xff] %vm253_vm0, %v310_v24 }
 0x1d4   :  { %322 = shalt.err (!%p319_p4)
}
 0x1d5   :  { %264 = dma.vmem_to_hbm [thread:$0]  %s262_s24, 128, %s574_s5, [#allocation3]  }
 0x1d6   :  { %331 = dma.done.wait [#allocation3], 128  }
 0x1d7   :  { %332 = vsyncadd [#allocation3], 4294967168 }
 0x1d8   :  { %268 = vsyncpa [#allocation3], 1 }

</bundles_post_ra>
